<compile_context>
chip_gen: v5e
topology: v5e:2x2
jax: 0.10.0
libtpu: 0.0.40
codegen_flags: <defaults>
</compile_context>

<pallas_src>
import math

import jax
import jax.numpy as jnp
from jax.experimental import pallas as pl
from jax.experimental.pallas import tpu as pltpu

# ---- model config (small, consistent with NoPEModelArgs semantics) ----
BATCH = 2
SEQ = 8
DIM = 32
N_HEADS = 4
N_KV_HEADS = N_HEADS            # forward() requires n_kv_heads == n_heads (n_rep == 1)
HEAD_DIM = DIM // N_HEADS       # 8
QKV_DIM = N_HEADS * HEAD_DIM    # 32
SCALE = 1.0 / math.sqrt(HEAD_DIM)


def attention_kernel(x_ref, wqkv_ref, wo_ref, mask_ref, out_ref):
    """Entire forward in one invocation.

    x_ref    : (B*S, DIM)        -- batch folded into the sublane axis
    wqkv_ref : (DIM, 3*QKV_DIM)  -- fused q/k/v projection weight
    wo_ref   : (QKV_DIM, DIM)
    mask_ref : (S, S)            -- additive mask (0 / -inf), float32
    out_ref  : (B*S, DIM)
    """
    x = x_ref[...]

    # Fused QKV projection: one MXU matmul with 96 output lanes.
    # TODO(synk): at real-model sizes cast MXU operands to bfloat16 (keep
    # preferred_element_type=f32) for v6e/v7x peak; softmax math stays f32.
    qkv = jnp.dot(x, wqkv_ref[...], preferred_element_type=jnp.float32)  # (B*S, 96)

    q = qkv[:, 0 * QKV_DIM:1 * QKV_DIM].reshape(BATCH, SEQ, QKV_DIM)
    k = qkv[:, 1 * QKV_DIM:2 * QKV_DIM].reshape(BATCH, SEQ, QKV_DIM)
    v = qkv[:, 2 * QKV_DIM:3 * QKV_DIM].reshape(BATCH, SEQ, QKV_DIM)

    mask = mask_ref[...]  # already float32

    # Per-head attention: heads are a short static loop (N_HEADS=4); the batch
    # dim is handled by batched dot_generals (no explicit kh.T). Head outputs
    # are folded straight into the output projection (accumulate o_h @ wo[h])
    # instead of concatenating 8-lane strips along the lane axis.
    acc = jnp.zeros((BATCH * SEQ, DIM), jnp.float32)
    for h in range(N_HEADS):
        lo = h * HEAD_DIM
        qh = q[:, :, lo:lo + HEAD_DIM]   # (B, S, hd)
        kh = k[:, :, lo:lo + HEAD_DIM]
        vh = v[:, :, lo:lo + HEAD_DIM]

        # scores = q k^T / sqrt(d) + mask  (float32, batched over B)
        s = jnp.einsum("bqd,bkd->bqk", qh, kh,
                       preferred_element_type=jnp.float32) * SCALE
        s = s + mask[None, :, :]

        # numerically-stable float32 softmax along keys
        s = s - jnp.max(s, axis=-1, keepdims=True)
        p = jnp.exp(s)
        # exact reciprocal keeps the 1e-4 test tolerance (use approx=True in prod)
        p = p * pl.reciprocal(jnp.sum(p, axis=-1, keepdims=True), approx=False)

        oh = jnp.einsum("bqk,bkd->bqd", p, vh,
                        preferred_element_type=jnp.float32)        # (B, S, hd)
        acc = acc + jnp.dot(oh.reshape(BATCH * SEQ, HEAD_DIM),
                            wo_ref[lo:lo + HEAD_DIM, :],
                            preferred_element_type=jnp.float32)

    # TODO(synk): DIM=32 < 128 lanes -> masked stores; at real-model DIM
    # (multiple of 128) this final store becomes lane-dense automatically.
    out_ref[...] = acc


def nope_attention(x, wq, wk, wv, wo, mask):
    B, S, D = x.shape
    wqkv = jnp.concatenate([wq, wk, wv], axis=1)   # (D, 3*QKV_DIM)
    x2d = x.reshape(B * S, D)                      # fold batch into sublanes

    out2d = pl.pallas_call(
        attention_kernel,
        out_shape=jax.ShapeDtypeStruct((B * S, D), jnp.float32),
        grid_spec=pltpu.PrefetchScalarGridSpec(
            num_scalar_prefetch=0,
            grid=(1,),                             # single step: no pipeline overhead
            in_specs=[
                pl.BlockSpec((B * S, D), lambda i: (0, 0)),
                pl.BlockSpec((D, 3 * QKV_DIM), lambda i: (0, 0)),
                pl.BlockSpec((QKV_DIM, D), lambda i: (0, 0)),
                pl.BlockSpec((S, S), lambda i: (0, 0)),
            ],
            out_specs=pl.BlockSpec((B * S, D), lambda i: (0, 0)),
        ),
        compiler_params=pltpu.CompilerParams(
            dimension_semantics=("arbitrary",)),
    )(x2d, wqkv, wo, mask)
    return out2d.reshape(B, S, D)


def reference_attention(x, wq, wk, wv, wo, mask):
    """Pure-JAX reference mirroring the PyTorch forward."""
    B, S, D = x.shape
    q = (x @ wq).reshape(B, S, N_HEADS, HEAD_DIM).transpose(0, 2, 1, 3)
    k = (x @ wk).reshape(B, S, N_KV_HEADS, HEAD_DIM).transpose(0, 2, 1, 3)
    v = (x @ wv).reshape(B, S, N_KV_HEADS, HEAD_DIM).transpose(0, 2, 1, 3)
    scores = jnp.einsum("bhqd,bhkd->bhqk", q, k) / math.sqrt(HEAD_DIM)
    scores = scores + mask[None, None]
    p = jax.nn.softmax(scores.astype(jnp.float32), axis=-1)
    out = jnp.einsum("bhqk,bhkd->bhqd", p, v)
    out = out.transpose(0, 2, 1, 3).reshape(B, S, N_HEADS * HEAD_DIM)
    return out @ wo


if __name__ == "__main__":
    key = jax.random.PRNGKey(0)
    kx, kq, kk, kv, ko = jax.random.split(key, 5)

    # deterministic "nn.Linear"-style init: U(-1/sqrt(fan_in), 1/sqrt(fan_in))
    def init_w(k, fan_in, fan_out):
        bound = 1.0 / math.sqrt(fan_in)
        return jax.random.uniform(
            k, (fan_in, fan_out), jnp.float32, minval=-bound, maxval=bound)

    x = jax.random.normal(kx, (BATCH, SEQ, DIM), jnp.float32)
    wq = init_w(kq, DIM, QKV_DIM)
    wk = init_w(kk, DIM, QKV_DIM)
    wv = init_w(kv, DIM, QKV_DIM)
    wo = init_w(ko, QKV_DIM, DIM)

    # causal additive mask, same convention as the PyTorch `mask` argument
    mask = jnp.where(
        jnp.tril(jnp.ones((SEQ, SEQ), dtype=bool)),
        jnp.zeros((SEQ, SEQ), jnp.float32),
        jnp.full((SEQ, SEQ), float("-inf"), jnp.float32),
    )

    out = nope_attention(x, wq, wk, wv, wo, mask)
    out = jax.block_until_ready(out)

    ref = reference_attention(x, wq, wk, wv, wo, mask)
    assert out.shape == (BATCH, SEQ, DIM)
    assert jnp.allclose(out, ref, atol=1e-4, rtol=1e-4), "mismatch vs reference"

    print("KERNEL_OK")
</pallas_src>

<mosaic_0001>
module attributes {stable_mosaic.version = 11 : i64} {
  func.func @attention_kernel(%arg0: i32, %arg1: memref<16x32xf32, #tpu.memory_space<vmem>>, %arg2: memref<32x96xf32, #tpu.memory_space<vmem>>, %arg3: memref<32x32xf32, #tpu.memory_space<vmem>>, %arg4: memref<8x8xf32, #tpu.memory_space<vmem>>, %arg5: memref<16x32xf32, #tpu.memory_space<vmem>>) attributes {dimension_semantics = [#tpu.dimension_semantics<arbitrary>], iteration_bounds = array<i64: 1>, scalar_prefetch = 0 : i64, scratch_operands = 0 : i64, tpu.core_type = #tpu.core_type<tc>, window_params = [{pipeline_mode = #tpu.pipeline_mode<synchronous>, transform_indices = @transform_0, window_bounds = array<i64: 16, 32>}, {pipeline_mode = #tpu.pipeline_mode<synchronous>, transform_indices = @transform_1, window_bounds = array<i64: 32, 96>}, {pipeline_mode = #tpu.pipeline_mode<synchronous>, transform_indices = @transform_2, window_bounds = array<i64: 32, 32>}, {pipeline_mode = #tpu.pipeline_mode<synchronous>, transform_indices = @transform_3, window_bounds = array<i64: 8, 8>}, {pipeline_mode = #tpu.pipeline_mode<synchronous>, transform_indices = @transform_4, window_bounds = array<i64: 16, 32>}]} {
    %c0 = arith.constant 0 : index
    %c0_0 = arith.constant 0 : index
    %0 = vector.load %arg1[%c0, %c0_0] : memref<16x32xf32, #tpu.memory_space<vmem>>, vector<16x32xf32>
    %c0_1 = arith.constant 0 : index
    %c0_2 = arith.constant 0 : index
    %1 = vector.load %arg2[%c0_1, %c0_2] : memref<32x96xf32, #tpu.memory_space<vmem>>, vector<32x96xf32>
    %cst = arith.constant dense<0.000000e+00> : vector<16x96xf32>
    %2 = tpu.matmul %0, %1, %cst {dimension_numbers = #tpu.dot_dimension_numbers<[1], [0], [0], [1], [0, 0, 1, 1], [], []>} : vector<16x32xf32>, vector<32x96xf32>, vector<16x96xf32> -> vector<16x96xf32>
    %3 = vector.extract_strided_slice %2 {offsets = [0, 0], sizes = [16, 32], strides = [1, 1]} : vector<16x96xf32> to vector<16x32xf32>
    %4 = vector.shape_cast %3 : vector<16x32xf32> to vector<2x8x32xf32>
    %5 = vector.extract_strided_slice %2 {offsets = [0, 32], sizes = [16, 32], strides = [1, 1]} : vector<16x96xf32> to vector<16x32xf32>
    %6 = vector.shape_cast %5 : vector<16x32xf32> to vector<2x8x32xf32>
    %7 = vector.extract_strided_slice %2 {offsets = [0, 64], sizes = [16, 32], strides = [1, 1]} : vector<16x96xf32> to vector<16x32xf32>
    %8 = vector.shape_cast %7 : vector<16x32xf32> to vector<2x8x32xf32>
    %c0_3 = arith.constant 0 : index
    %c0_4 = arith.constant 0 : index
    %9 = vector.load %arg4[%c0_3, %c0_4] : memref<8x8xf32, #tpu.memory_space<vmem>>, vector<8x8xf32>
    %cst_5 = arith.constant 0.000000e+00 : f32
    %10 = vector.broadcast %cst_5 : f32 to vector<16x32xf32>
    %11 = vector.extract_strided_slice %4 {offsets = [0, 0, 0], sizes = [2, 8, 8], strides = [1, 1, 1]} : vector<2x8x32xf32> to vector<2x8x8xf32>
    %12 = vector.extract_strided_slice %6 {offsets = [0, 0, 0], sizes = [2, 8, 8], strides = [1, 1, 1]} : vector<2x8x32xf32> to vector<2x8x8xf32>
    %13 = vector.extract_strided_slice %8 {offsets = [0, 0, 0], sizes = [2, 8, 8], strides = [1, 1, 1]} : vector<2x8x32xf32> to vector<2x8x8xf32>
    "tpu.trace_start"() <{level = 10 : i32, message = "bqd,bkd->bqk"}> : () -> ()
    %cst_6 = arith.constant dense<0.000000e+00> : vector<2x8x8xf32>
    %14 = tpu.matmul %11, %12, %cst_6 {dimension_numbers = #tpu.dot_dimension_numbers<[2], [2], [1], [1], [0, 0, 0, 1, 1, 1], [0], [0]>} : vector<2x8x8xf32>, vector<2x8x8xf32>, vector<2x8x8xf32> -> vector<2x8x8xf32>
    "tpu.trace_stop"() : () -> ()
    %cst_7 = arith.constant 0.353553385 : f32
    %15 = vector.broadcast %cst_7 : f32 to vector<2x8x8xf32>
    %16 = arith.mulf %14, %15 : vector<2x8x8xf32>
    %17 = vector.shape_cast %9 : vector<8x8xf32> to vector<1x8x8xf32>
    %18 = vector.broadcast %17 : vector<1x8x8xf32> to vector<2x8x8xf32>
    %19 = arith.addf %16, %18 : vector<2x8x8xf32>
    %cst_8 = arith.constant dense<0xFF800000> : vector<2x8xf32>
    %20 = vector.multi_reduction <maximumf>, %19, %cst_8 [2] : vector<2x8x8xf32> to vector<2x8xf32>
    %21 = vector.shape_cast %20 : vector<2x8xf32> to vector<2x8x1xf32>
    %22 = vector.broadcast %21 : vector<2x8x1xf32> to vector<2x8x8xf32>
    %23 = arith.subf %19, %22 : vector<2x8x8xf32>
    %24 = math.exp %23 : vector<2x8x8xf32>
    %cst_9 = arith.constant dense<0.000000e+00> : vector<2x8xf32>
    %25 = vector.multi_reduction <add>, %24, %cst_9 [2] : vector<2x8x8xf32> to vector<2x8xf32>
    %26 = vector.shape_cast %25 : vector<2x8xf32> to vector<2x8x1xf32>
    %27 = tpu.reciprocal %26 : vector<2x8x1xf32> -> vector<2x8x1xf32>
    %28 = vector.broadcast %27 : vector<2x8x1xf32> to vector<2x8x8xf32>
    %29 = arith.mulf %24, %28 : vector<2x8x8xf32>
    "tpu.trace_start"() <{level = 10 : i32, message = "bqk,bkd->bqd"}> : () -> ()
    %cst_10 = arith.constant dense<0.000000e+00> : vector<2x8x8xf32>
    %30 = tpu.matmul %29, %13, %cst_10 {dimension_numbers = #tpu.dot_dimension_numbers<[2], [1], [1], [2], [0, 0, 0, 1, 1, 2], [0], [0]>} : vector<2x8x8xf32>, vector<2x8x8xf32>, vector<2x8x8xf32> -> vector<2x8x8xf32>
    "tpu.trace_stop"() : () -> ()
    %31 = vector.shape_cast %30 : vector<2x8x8xf32> to vector<16x8xf32>
    %c0_11 = arith.constant 0 : index
    %c0_12 = arith.constant 0 : index
    %32 = vector.load %arg3[%c0_11, %c0_12] : memref<32x32xf32, #tpu.memory_space<vmem>>, vector<8x32xf32>
    %cst_13 = arith.constant dense<0.000000e+00> : vector<16x32xf32>
    %33 = tpu.matmul %31, %32, %cst_13 {dimension_numbers = #tpu.dot_dimension_numbers<[1], [0], [0], [1], [0, 0, 1, 1], [], []>} : vector<16x8xf32>, vector<8x32xf32>, vector<16x32xf32> -> vector<16x32xf32>
    %34 = arith.addf %10, %33 : vector<16x32xf32>
    %35 = vector.extract_strided_slice %4 {offsets = [0, 0, 8], sizes = [2, 8, 8], strides = [1, 1, 1]} : vector<2x8x32xf32> to vector<2x8x8xf32>
    %36 = vector.extract_strided_slice %6 {offsets = [0, 0, 8], sizes = [2, 8, 8], strides = [1, 1, 1]} : vector<2x8x32xf32> to vector<2x8x8xf32>
    %37 = vector.extract_strided_slice %8 {offsets = [0, 0, 8], sizes = [2, 8, 8], strides = [1, 1, 1]} : vector<2x8x32xf32> to vector<2x8x8xf32>
    "tpu.trace_start"() <{level = 10 : i32, message = "bqd,bkd->bqk"}> : () -> ()
    %cst_14 = arith.constant dense<0.000000e+00> : vector<2x8x8xf32>
    %38 = tpu.matmul %35, %36, %cst_14 {dimension_numbers = #tpu.dot_dimension_numbers<[2], [2], [1], [1], [0, 0, 0, 1, 1, 1], [0], [0]>} : vector<2x8x8xf32>, vector<2x8x8xf32>, vector<2x8x8xf32> -> vector<2x8x8xf32>
    "tpu.trace_stop"() : () -> ()
    %cst_15 = arith.constant 0.353553385 : f32
    %39 = vector.broadcast %cst_15 : f32 to vector<2x8x8xf32>
    %40 = arith.mulf %38, %39 : vector<2x8x8xf32>
    %41 = vector.shape_cast %9 : vector<8x8xf32> to vector<1x8x8xf32>
    %42 = vector.broadcast %41 : vector<1x8x8xf32> to vector<2x8x8xf32>
    %43 = arith.addf %40, %42 : vector<2x8x8xf32>
    %cst_16 = arith.constant dense<0xFF800000> : vector<2x8xf32>
    %44 = vector.multi_reduction <maximumf>, %43, %cst_16 [2] : vector<2x8x8xf32> to vector<2x8xf32>
    %45 = vector.shape_cast %44 : vector<2x8xf32> to vector<2x8x1xf32>
    %46 = vector.broadcast %45 : vector<2x8x1xf32> to vector<2x8x8xf32>
    %47 = arith.subf %43, %46 : vector<2x8x8xf32>
    %48 = math.exp %47 : vector<2x8x8xf32>
    %cst_17 = arith.constant dense<0.000000e+00> : vector<2x8xf32>
    %49 = vector.multi_reduction <add>, %48, %cst_17 [2] : vector<2x8x8xf32> to vector<2x8xf32>
    %50 = vector.shape_cast %49 : vector<2x8xf32> to vector<2x8x1xf32>
    %51 = tpu.reciprocal %50 : vector<2x8x1xf32> -> vector<2x8x1xf32>
    %52 = vector.broadcast %51 : vector<2x8x1xf32> to vector<2x8x8xf32>
    %53 = arith.mulf %48, %52 : vector<2x8x8xf32>
    "tpu.trace_start"() <{level = 10 : i32, message = "bqk,bkd->bqd"}> : () -> ()
    %cst_18 = arith.constant dense<0.000000e+00> : vector<2x8x8xf32>
    %54 = tpu.matmul %53, %37, %cst_18 {dimension_numbers = #tpu.dot_dimension_numbers<[2], [1], [1], [2], [0, 0, 0, 1, 1, 2], [0], [0]>} : vector<2x8x8xf32>, vector<2x8x8xf32>, vector<2x8x8xf32> -> vector<2x8x8xf32>
    "tpu.trace_stop"() : () -> ()
    %55 = vector.shape_cast %54 : vector<2x8x8xf32> to vector<16x8xf32>
    %c8 = arith.constant 8 : index
    %c0_19 = arith.constant 0 : index
    %56 = vector.load %arg3[%c8, %c0_19] : memref<32x32xf32, #tpu.memory_space<vmem>>, vector<8x32xf32>
    %cst_20 = arith.constant dense<0.000000e+00> : vector<16x32xf32>
    %57 = tpu.matmul %55, %56, %cst_20 {dimension_numbers = #tpu.dot_dimension_numbers<[1], [0], [0], [1], [0, 0, 1, 1], [], []>} : vector<16x8xf32>, vector<8x32xf32>, vector<16x32xf32> -> vector<16x32xf32>
    %58 = arith.addf %34, %57 : vector<16x32xf32>
    %59 = vector.extract_strided_slice %4 {offsets = [0, 0, 16], sizes = [2, 8, 8], strides = [1, 1, 1]} : vector<2x8x32xf32> to vector<2x8x8xf32>
    %60 = vector.extract_strided_slice %6 {offsets = [0, 0, 16], sizes = [2, 8, 8], strides = [1, 1, 1]} : vector<2x8x32xf32> to vector<2x8x8xf32>
    %61 = vector.extract_strided_slice %8 {offsets = [0, 0, 16], sizes = [2, 8, 8], strides = [1, 1, 1]} : vector<2x8x32xf32> to vector<2x8x8xf32>
    "tpu.trace_start"() <{level = 10 : i32, message = "bqd,bkd->bqk"}> : () -> ()
    %cst_21 = arith.constant dense<0.000000e+00> : vector<2x8x8xf32>
    %62 = tpu.matmul %59, %60, %cst_21 {dimension_numbers = #tpu.dot_dimension_numbers<[2], [2], [1], [1], [0, 0, 0, 1, 1, 1], [0], [0]>} : vector<2x8x8xf32>, vector<2x8x8xf32>, vector<2x8x8xf32> -> vector<2x8x8xf32>
    "tpu.trace_stop"() : () -> ()
    %cst_22 = arith.constant 0.353553385 : f32
    %63 = vector.broadcast %cst_22 : f32 to vector<2x8x8xf32>
    %64 = arith.mulf %62, %63 : vector<2x8x8xf32>
    %65 = vector.shape_cast %9 : vector<8x8xf32> to vector<1x8x8xf32>
    %66 = vector.broadcast %65 : vector<1x8x8xf32> to vector<2x8x8xf32>
    %67 = arith.addf %64, %66 : vector<2x8x8xf32>
    %cst_23 = arith.constant dense<0xFF800000> : vector<2x8xf32>
    %68 = vector.multi_reduction <maximumf>, %67, %cst_23 [2] : vector<2x8x8xf32> to vector<2x8xf32>
    %69 = vector.shape_cast %68 : vector<2x8xf32> to vector<2x8x1xf32>
    %70 = vector.broadcast %69 : vector<2x8x1xf32> to vector<2x8x8xf32>
    %71 = arith.subf %67, %70 : vector<2x8x8xf32>
    %72 = math.exp %71 : vector<2x8x8xf32>
    %cst_24 = arith.constant dense<0.000000e+00> : vector<2x8xf32>
    %73 = vector.multi_reduction <add>, %72, %cst_24 [2] : vector<2x8x8xf32> to vector<2x8xf32>
    %74 = vector.shape_cast %73 : vector<2x8xf32> to vector<2x8x1xf32>
    %75 = tpu.reciprocal %74 : vector<2x8x1xf32> -> vector<2x8x1xf32>
    %76 = vector.broadcast %75 : vector<2x8x1xf32> to vector<2x8x8xf32>
    %77 = arith.mulf %72, %76 : vector<2x8x8xf32>
    "tpu.trace_start"() <{level = 10 : i32, message = "bqk,bkd->bqd"}> : () -> ()
    %cst_25 = arith.constant dense<0.000000e+00> : vector<2x8x8xf32>
    %78 = tpu.matmul %77, %61, %cst_25 {dimension_numbers = #tpu.dot_dimension_numbers<[2], [1], [1], [2], [0, 0, 0, 1, 1, 2], [0], [0]>} : vector<2x8x8xf32>, vector<2x8x8xf32>, vector<2x8x8xf32> -> vector<2x8x8xf32>
    "tpu.trace_stop"() : () -> ()
    %79 = vector.shape_cast %78 : vector<2x8x8xf32> to vector<16x8xf32>
    %c16 = arith.constant 16 : index
    %c0_26 = arith.constant 0 : index
    %80 = vector.load %arg3[%c16, %c0_26] : memref<32x32xf32, #tpu.memory_space<vmem>>, vector<8x32xf32>
    %cst_27 = arith.constant dense<0.000000e+00> : vector<16x32xf32>
    %81 = tpu.matmul %79, %80, %cst_27 {dimension_numbers = #tpu.dot_dimension_numbers<[1], [0], [0], [1], [0, 0, 1, 1], [], []>} : vector<16x8xf32>, vector<8x32xf32>, vector<16x32xf32> -> vector<16x32xf32>
    %82 = arith.addf %58, %81 : vector<16x32xf32>
    %83 = vector.extract_strided_slice %4 {offsets = [0, 0, 24], sizes = [2, 8, 8], strides = [1, 1, 1]} : vector<2x8x32xf32> to vector<2x8x8xf32>
    %84 = vector.extract_strided_slice %6 {offsets = [0, 0, 24], sizes = [2, 8, 8], strides = [1, 1, 1]} : vector<2x8x32xf32> to vector<2x8x8xf32>
    %85 = vector.extract_strided_slice %8 {offsets = [0, 0, 24], sizes = [2, 8, 8], strides = [1, 1, 1]} : vector<2x8x32xf32> to vector<2x8x8xf32>
    "tpu.trace_start"() <{level = 10 : i32, message = "bqd,bkd->bqk"}> : () -> ()
    %cst_28 = arith.constant dense<0.000000e+00> : vector<2x8x8xf32>
    %86 = tpu.matmul %83, %84, %cst_28 {dimension_numbers = #tpu.dot_dimension_numbers<[2], [2], [1], [1], [0, 0, 0, 1, 1, 1], [0], [0]>} : vector<2x8x8xf32>, vector<2x8x8xf32>, vector<2x8x8xf32> -> vector<2x8x8xf32>
    "tpu.trace_stop"() : () -> ()
    %cst_29 = arith.constant 0.353553385 : f32
    %87 = vector.broadcast %cst_29 : f32 to vector<2x8x8xf32>
    %88 = arith.mulf %86, %87 : vector<2x8x8xf32>
    %89 = vector.shape_cast %9 : vector<8x8xf32> to vector<1x8x8xf32>
    %90 = vector.broadcast %89 : vector<1x8x8xf32> to vector<2x8x8xf32>
    %91 = arith.addf %88, %90 : vector<2x8x8xf32>
    %cst_30 = arith.constant dense<0xFF800000> : vector<2x8xf32>
    %92 = vector.multi_reduction <maximumf>, %91, %cst_30 [2] : vector<2x8x8xf32> to vector<2x8xf32>
    %93 = vector.shape_cast %92 : vector<2x8xf32> to vector<2x8x1xf32>
    %94 = vector.broadcast %93 : vector<2x8x1xf32> to vector<2x8x8xf32>
    %95 = arith.subf %91, %94 : vector<2x8x8xf32>
    %96 = math.exp %95 : vector<2x8x8xf32>
    %cst_31 = arith.constant dense<0.000000e+00> : vector<2x8xf32>
    %97 = vector.multi_reduction <add>, %96, %cst_31 [2] : vector<2x8x8xf32> to vector<2x8xf32>
    %98 = vector.shape_cast %97 : vector<2x8xf32> to vector<2x8x1xf32>
    %99 = tpu.reciprocal %98 : vector<2x8x1xf32> -> vector<2x8x1xf32>
    %100 = vector.broadcast %99 : vector<2x8x1xf32> to vector<2x8x8xf32>
    %101 = arith.mulf %96, %100 : vector<2x8x8xf32>
    "tpu.trace_start"() <{level = 10 : i32, message = "bqk,bkd->bqd"}> : () -> ()
    %cst_32 = arith.constant dense<0.000000e+00> : vector<2x8x8xf32>
    %102 = tpu.matmul %101, %85, %cst_32 {dimension_numbers = #tpu.dot_dimension_numbers<[2], [1], [1], [2], [0, 0, 0, 1, 1, 2], [0], [0]>} : vector<2x8x8xf32>, vector<2x8x8xf32>, vector<2x8x8xf32> -> vector<2x8x8xf32>
    "tpu.trace_stop"() : () -> ()
    %103 = vector.shape_cast %102 : vector<2x8x8xf32> to vector<16x8xf32>
    %c24 = arith.constant 24 : index
    %c0_33 = arith.constant 0 : index
    %104 = vector.load %arg3[%c24, %c0_33] : memref<32x32xf32, #tpu.memory_space<vmem>>, vector<8x32xf32>
    %cst_34 = arith.constant dense<0.000000e+00> : vector<16x32xf32>
    %105 = tpu.matmul %103, %104, %cst_34 {dimension_numbers = #tpu.dot_dimension_numbers<[1], [0], [0], [1], [0, 0, 1, 1], [], []>} : vector<16x8xf32>, vector<8x32xf32>, vector<16x32xf32> -> vector<16x32xf32>
    %106 = arith.addf %82, %105 : vector<16x32xf32>
    %c0_35 = arith.constant 0 : index
    %c0_36 = arith.constant 0 : index
    %107 = vector.load %arg5[%c0_35, %c0_36] : memref<16x32xf32, #tpu.memory_space<vmem>>, vector<16x32xf32>
    tpu.vector_store %arg5[%c0_35, %c0_36], %106 {strides = array<i32>} : memref<16x32xf32, #tpu.memory_space<vmem>>, vector<16x32xf32>,
    return
  }
  func.func @transform_0(%arg0: i32) -> (i32, i32) {
    %c0_i32 = arith.constant 0 : i32
    %c0_i32_0 = arith.constant 0 : i32
    %c0_i32_1 = arith.constant 0 : i32
    return %c0_i32, %c0_i32_0 : i32, i32
  }
  func.func @transform_1(%arg0: i32) -> (i32, i32) {
    %c0_i32 = arith.constant 0 : i32
    %c0_i32_0 = arith.constant 0 : i32
    %c0_i32_1 = arith.constant 0 : i32
    return %c0_i32, %c0_i32_0 : i32, i32
  }
  func.func @transform_2(%arg0: i32) -> (i32, i32) {
    %c0_i32 = arith.constant 0 : i32
    %c0_i32_0 = arith.constant 0 : i32
    %c0_i32_1 = arith.constant 0 : i32
    return %c0_i32, %c0_i32_0 : i32, i32
  }
  func.func @transform_3(%arg0: i32) -> (i32, i32) {
    %c0_i32 = arith.constant 0 : i32
    %c0_i32_0 = arith.constant 0 : i32
    %c0_i32_1 = arith.constant 0 : i32
    return %c0_i32, %c0_i32_0 : i32, i32
  }
  func.func @transform_4(%arg0: i32) -> (i32, i32) {
    %c0_i32 = arith.constant 0 : i32
    %c0_i32_0 = arith.constant 0 : i32
    %c0_i32_1 = arith.constant 0 : i32
    return %c0_i32, %c0_i32_0 : i32, i32
  }
}

</mosaic_0001>

<bundles_post_ra>
// kernel: tpu_custom_call.1
= control target key start
LH: loop header
LB: loop body
LE: loop exit
PB: predicated region body
PF: predicated region fallthrough
CT: control target
= control target key end

     0   :  { %9 = vsyncpa [#allocation3], 0  ;;  %s1294_s0 = inlined_call_operand.hbm [shape: f32[16,32], index: 0, kind: input, shape index: {}]   ;;  %s1295_s1 = inlined_call_operand.hbm [shape: f32[32,96], index: 1, kind: input, shape index: {}]   ;;  %s1296_s2 = inlined_call_operand.hbm [shape: f32[32,32], index: 2, kind: input, shape index: {}]   ;;  %s1297_s3 = inlined_call_operand.hbm [shape: f32[8,8], index: 3, kind: input, shape index: {}]   ;;  %s1298_s4 = inlined_call_operand.hbm [shape: f32[16,32], index: 4, kind: output, shape index: {}]  }
   0x1   :  { %10 = vsyncpa [#allocation6], 0 }
   0x2   :  { %11 = vsyncpa [#allocation9], 0 }
   0x3   :  { %12 = vsyncpa [#allocation4], 0  ;;  %s30_s17 = sshll.u32 %s1295_s1, 4  ;;  %s1114_s18 = smov [#allocation5]   ;;  %s31_s17 = int_to_ptr.hbm [resolvable:$true] %s30_s17 }
   0x4   :  { %s32_s19 = sshll.u32 %s1114_s18, 4  ;;  %s17_s22 = sshll.u32 %s1294_s0, 4  ;;  %s33_s19 = int_to_ptr.vmem [resolvable:$true] %s32_s19  ;;  %s18_s22 = int_to_ptr.hbm [resolvable:$true] %s17_s22 }
   0x5   :  { %s1115_s23 = smov 128   ;;  %s1116_s24 = smov 8  }
   0x6   :  { %38 = dma.hbm_to_vmem [thread:$0]  %s31_s17, 512, %s33_s19, [#allocation6], %s1115_s23, %s1115_s23, %s1116_s24  }
   0x7   :  { %s1117_s25 = smov [#allocation2]   ;;  %s43_s1 = sshll.u32 %s1296_s2, 4  ;;  %s44_s1 = int_to_ptr.hbm [resolvable:$true] %s43_s1 }
   0x8   :  { %s19_s26 = sshll.u32 %s1117_s25, 4  ;;  %s57_s30 = sshll.u32 %s1297_s3, 4  ;;  %s20_s26 = int_to_ptr.vmem [resolvable:$true] %s19_s26  ;;  %s58_s30 = int_to_ptr.hbm [resolvable:$true] %s57_s30 }
   0x9   :  { %25 = dma.hbm_to_vmem [thread:$0]  %s18_s22, 256, %s20_s26, [#allocation3], %s1115_s23, %s1115_s23, %s1116_s24  }
   0xa   :  { %s1118_s5 = smov [#allocation7]   ;;  %s1119_s7 = smov [#allocation8]  }
   0xb   :  { %s45_s6 = sshll.u32 %s1118_s5, 4  ;;  %s59_s2 = sshll.u32 %s1119_s7, 4  ;;  %s46_s6 = int_to_ptr.vmem [resolvable:$true] %s45_s6  ;;  %s60_s2 = int_to_ptr.vmem [resolvable:$true] %s59_s2 }
   0xc   :  { %51 = dma.hbm_to_vmem [thread:$0]  %s44_s1, 512, %s46_s6, [#allocation6], %s1115_s23, %s1115_s23, %s1116_s24  }
   0xd   :  { %62 = dma.hbm_to_vmem [thread:$0]  %s58_s30, 128, %s60_s2, [#allocation9]  }
   0xe   :  { %1106 = dma.done.wait [#allocation3], 256  }
   0xf   :  { %1107 = vsyncadd [#allocation3], 4294967040 }
  0x10   :  { %1108 = dma.done.wait [#allocation6], 1024  }
  0x11   :  { %1109 = vsyncadd [#allocation6], 4294966272 }
  0x12   :  { %1110 = dma.done.wait [#allocation9], 128  }
  0x13   :  { %1111 = vsyncadd [#allocation9], 4294967168  ;;  %v84_v0 = vld [vmem:[#allocation5 + $0x18] sm:$0xff]  ;;  %v83_v1 = vld [vmem:[#allocation5 + $0x10] sm:$0xff]  ;;  %vm85_vm0 = vcmask 261120   ;;  %s1120_s3 = smov 64  }
  0x14   :  { %104 = vmatpush.msra.mxu0 %v84_v0  ;;  %v82_v2 = vld [vmem:[#allocation5 + $0x8] sm:$0xff]  ;;  %v81_v3 = vld [vmem:[#allocation5] sm:$0xff]  ;;  %v79_v4 = vld [vmem:[#allocation2] sm:$0xff]  ;;  %s1121_s8 = smov 96   ;;  %s1122_s9 = smov 88   ;;  %vm119_vm1 = vcmask 64512  }
  0x15   :  { %s1123_s10 = smov 120   ;;  %v80_v9 = vld [vmem:[#allocation2 + $0x8] sm:$0xff]  ;;  %v1193_v11 = vld [vmem:[#allocation8] sm:$0xff]  ;;  %s1124_s11 = smov 80  }
  0x16   :  { %105 = vmatpush.msra.mxu0 %v83_v1  ;;  %v275_v35 = vld [vmem:[#allocation7] sm:$0xff]  ;;  %s1125_s12 = smov 56   ;;  %s1126_s13 = smov 112  }
  0x17   :  { %s1127_s14 = smov 72   ;;  %s1128_s15 = smov 104  }
  0x18   :  { %106 = vmatpush.msra.mxu0 %v82_v2  ;;  %s1129_s16 = smov 48   ;;  %s1130_s17 = smov 40  }
  0x19   :  { %s1131_s18 = smov [#allocation10]   ;;  %s887_s22 = sshll.u32 %s1298_s4, 4  ;;  %s888_s22 = int_to_ptr.hbm [resolvable:$true] %s887_s22 }
  0x1a   :  { %107 = vmatpush.msra.mxu0 %v81_v3  ;;  %s885_s19 = sshll.u32 %s1131_s18, 4  ;;  %s886_s19 = int_to_ptr.vmem [resolvable:$true] %s885_s19 }
  0x1b   :  { %902 = vmatmul.msk.f32.vlgmr.msra.gmra.mxu0 %vm85_vm0, %v79_v4 }
  0x1c   :  { %487 = vmatpush.msrb.mxu0 %v275_v35 }
  0x23   :  { %903 = vmatmul.msk.f32.gmra.mxu0 %vm85_vm0, %v80_v9 }
  0x98   :  { %v1179_v5 = vpop.f32.mrf.mxu0 }
  0x99   :  { %223 = vrot.lane.b32.xlu2 %v1179_v5, %s1120_s3  ;;  %117 = vrot.lane.b32.xlu0 %v1179_v5, %s1121_s8 }
  0xa0   :  { %v1198_v20 = vpop.f32.mrf.mxu0 }
  0xa1   :  { %278 = vrot.lane.b32.xlu2 %v1179_v5, %s1122_s9 }
  0xa9   :  { %276 = vrot.lane.b32.xlu2 %v1179_v5, %s1123_s10 }
  0xf3   :  { %v224_v6 = vpop.permute.xlu2 %223 }
  0xfb   :  { %v279_v8 = vpop.permute.xlu2 %278 }
 0x103   :  { %v277_v34 = vpop.permute.xlu2 %276 }
 0x10b   :  { %v118_v7 = vpop.permute.xlu0 %117 }
 0x10c   :  { %904 = vmatpush.xpose.msk.msra.mxu1 %vm119_vm1, %v118_v7 }
 0x10f   :  { %905 = vmatmul.msk.f32.vlgmr.msra.gmra.mxu1 %vm119_vm1, %v1179_v5 }
 0x110   :  { %244 = vmatpush.msrb.mxu1 %v224_v6 }
 0x112   :  { %910 = vmatpush.xpose.msk.msra.mxu1 %vm119_vm1, %v279_v8 }
 0x18c   :  { %v141_v10 = vpop.f32.mrf.mxu1 }
 0x18d   :  { %v171_v12 = vmul.f32 0.35355338, %v141_v10 }
 0x18f   :  { %v173_v13 = vadd.f32 %v171_v12, %v1193_v11 }
 0x191   :  { %v175_v14 = vsel %vm119_vm1, %v173_v13, -inf }
 0x192   :  { %176 = vmax.xlane.f32.xlu0 %v175_v14 }
 0x205   :  { %v177_v15 = vpop.xlane.xlu0 %176 }
 0x206   :  { %v181_v16 = vsub.f32 %v173_v13, %v177_v15 }
 0x208   :  { %v183_v17 = vmul.f32 1.442695, %v181_v16 }
 0x20a   :  { %954 = vpow2.f32 %v183_v17 }
 0x210   :  { %v955_v18 = vpop.eup %954 }
 0x211   :  { %v187_v19 = vsel %vm119_vm1, %v955_v18, 0.0 }
 0x212   :  { %188 = vadd.xlane.f32.xlu1 %v187_v19 }
 0x22b   :  { %145 = vrot.lane.b32.xlu1 %v1198_v20, %s1121_s8 }
 0x285   :  { %v189_v21 = vpop.xlane.xlu1 %188 }
 0x286   :  { %956 = vrcp.f32 %v189_v21  ;;  %v204_v25 = vand.u32 2147483648, %v189_v21  ;;  %v202_v27 = vand.u32 2147483647, %v189_v21  ;;  %vm198_vm3 = vweird.f32 %v189_v21 }
 0x288   :  { %v205_v29 = vor.u32 1.1754944e-38, %v204_v25  ;;  %vm203_vm5 = vcmp.eq.f32.partialorder %v202_v27, 8.507059e+37 }
 0x28c   :  { %v957_v22 = vpop.eup %956 }
 0x28d   :  { %v194_v23 = vmul.f32 %v957_v22, %v189_v21  ;;  %vm199_vm2 = vweird.f32 %v957_v22 }
 0x28e   :  { %vm200_vm4 = vmor %vm198_vm3, %vm199_vm2 }
 0x28f   :  { %v195_v24 = vsub.f32 1.0, %v194_v23 }
 0x291   :  { %v196_v26 = vmul.f32 %v957_v22, %v195_v24 }
 0x293   :  { %v197_v28 = vadd.f32 %v957_v22, %v196_v26 }
 0x295   :  { %v201_v30 = vsel %vm200_vm4, %v957_v22, %v197_v28 }
 0x296   :  { %v206_v31 = vsel %vm203_vm5, %v205_v29, %v201_v30  ;;  %v436_v29 = vld [vmem:[#allocation7 + $0x8] sm:$0xff] }
 0x297   :  { %v221_v32 = vmul.f32 %v955_v18, %v206_v31 }
 0x299   :  { %908 = vmatmul.msk.f32.vlgmr.msrb.gmra.mxu1 %vm119_vm1, %v221_v32 }
 0x29d   :  { %v146_v33 = vpop.permute.xlu1 %145 }
 0x29e   :  { %906 = vmatpush.xpose.msk.msra.mxu2 %vm119_vm1, %v146_v33 }
 0x2a1   :  { %907 = vmatmul.msk.f32.vlgmr.msra.gmra.mxu2 %vm119_vm1, %v1198_v20  ;;  %911 = vmatmul.msk.f32.vlgmr.msra.gmra.mxu1 %vm119_vm1, %v277_v34 }
 0x316   :  { %v246_v36 = vpop.f32.mrf.mxu1 }
 0x317   :  { %918 = vmatmul.msk.f32.vlgmr.msrb.gmra.mxu0 %vm119_vm1, %v246_v36 }
 0x31e   :  { %v301_v37 = vpop.f32.mrf.mxu1 }
 0x31f   :  { %v332_v38 = vmul.f32 0.35355338, %v301_v37 }
 0x321   :  { %v334_v39 = vadd.f32 %v332_v38, %v1193_v11 }
 0x323   :  { %v336_v40 = vsel %vm119_vm1, %v334_v39, -inf }
 0x324   :  { %337 = vmax.xlane.f32.xlu1 %v336_v40  ;;  %v168_v41 = vpop.f32.mrf.mxu2 }
 0x325   :  { %v172_v42 = vmul.f32 0.35355338, %v168_v41 }
 0x327   :  { %v174_v43 = vadd.f32 %v172_v42, %v1193_v11 }
 0x329   :  { %v178_v44 = vsel %vm119_vm1, %v174_v43, -inf }
 0x32a   :  { %179 = vmax.xlane.f32.xlu2 %v178_v44 }
 0x33d   :  { %304 = vrot.lane.b32.xlu1 %v1198_v20, %s1123_s10 }
 0x342   :  { %249 = vrot.lane.b32.xlu2 %v1198_v20, %s1120_s3 }
 0x34a   :  { %497 = vrot.lane.b32.xlu2 %v1179_v5, %s1124_s11 }
 0x397   :  { %v338_v51 = vpop.xlane.xlu1 %337 }
 0x398   :  { %v342_v52 = vsub.f32 %v334_v39, %v338_v51 }
 0x39a   :  { %v344_v53 = vmul.f32 1.442695, %v342_v52 }
 0x39d   :  { %v180_v45 = vpop.xlane.xlu2 %179 }
 0x39e   :  { %v182_v46 = vsub.f32 %v174_v43, %v180_v45 }
 0x3a0   :  { %v185_v47 = vmul.f32 1.442695, %v182_v46 }
 0x3a2   :  { %958 = vpow2.f32 %v185_v47 }
 0x3a3   :  { %960 = vpow2.f32 %v344_v53 }
 0x3a5   :  { %v250_v48 = vpop.permute.xlu2 %249 }
 0x3a6   :  { %270 = vmatpush.msra.mxu3 %v250_v48 }
 0x3a8   :  { %v959_v49 = vpop.eup %958 }
 0x3a9   :  { %v190_v50 = vsel %vm119_vm1, %v959_v49, 0.0  ;;  %v961_v54 = vpop.eup %960 }
 0x3aa   :  { %191 = vadd.xlane.f32.xlu0 %v190_v50  ;;  %v348_v55 = vsel %vm119_vm1, %v961_v54, 0.0 }
 0x3ad   :  { %v498_v8 = vpop.permute.xlu2 %497 }
 0x3af   :  { %v305_v6 = vpop.permute.xlu1 %304 }
 0x3be   :  { %306 = vrot.lane.b32.xlu0 %v1198_v20, %s1122_s9 }
 0x3c6   :  { %384 = vrot.lane.b32.xlu0 %v1179_v5, %s1125_s12 }
 0x3f0   :  { %349 = vadd.xlane.f32.xlu0 %v348_v55 }
 0x404   :  { %495 = vrot.lane.b32.xlu0 %v1179_v5, %s1126_s13 }
 0x41d   :  { %v192_v56 = vpop.xlane.xlu0 %191 }
 0x41e   :  { %962 = vrcp.f32 %v192_v56  ;;  %v218_v60 = vand.u32 2147483648, %v192_v56  ;;  %v216_v62 = vand.u32 2147483647, %v192_v56  ;;  %vm212_vm7 = vweird.f32 %v192_v56 }
 0x420   :  { %v219_v0 = vor.u32 1.1754944e-38, %v218_v60  ;;  %vm217_vm9 = vcmp.eq.f32.partialorder %v216_v62, 8.507059e+37 }
 0x424   :  { %v963_v57 = vpop.eup %962 }
 0x425   :  { %v208_v58 = vmul.f32 %v963_v57, %v192_v56  ;;  %vm213_vm6 = vweird.f32 %v963_v57 }
 0x426   :  { %vm214_vm8 = vmor %vm212_vm7, %vm213_vm6 }
 0x427   :  { %v209_v59 = vsub.f32 1.0, %v208_v58 }
 0x429   :  { %v210_v61 = vmul.f32 %v963_v57, %v209_v59 }
 0x42b   :  { %v211_v63 = vadd.f32 %v963_v57, %v210_v61 }
 0x42d   :  { %v215_v1 = vsel %vm214_vm8, %v963_v57, %v211_v63 }
 0x42e   :  { %v220_v2 = vsel %vm217_vm9, %v219_v0, %v215_v1 }
 0x42f   :  { %v222_v3 = vmul.f32 %v959_v49, %v220_v2 }
 0x430   :  { %v307_v4 = vpop.permute.xlu0 %306 }
 0x431   :  { %909 = vmatmul.msk.f32.vlgmr.msra.gmra.mxu3 %vm119_vm1, %v222_v3  ;;  %912 = vmatpush.xpose.msk.msrb.mxu2 %vm119_vm1, %v307_v4 }
 0x434   :  { %913 = vmatmul.msk.f32.vlgmr.msrb.gmra.mxu2 %vm119_vm1, %v305_v6 }
 0x435   :  { %458 = vmatpush.msra.mxu2 %v436_v29 }
 0x438   :  { %v385_v7 = vpop.permute.xlu0 %384 }
 0x439   :  { %405 = vmatpush.msrb.mxu3 %v385_v7 }
 0x43b   :  { %920 = vmatpush.xpose.msk.msra.mxu3 %vm119_vm1, %v498_v8 }
 0x463   :  { %v350_v9 = vpop.xlane.xlu0 %349 }
 0x464   :  { %964 = vrcp.f32 %v350_v9  ;;  %v365_v14 = vand.u32 2147483648, %v350_v9  ;;  %v363_v16 = vand.u32 2147483647, %v350_v9  ;;  %vm359_vm11 = vweird.f32 %v350_v9 }
 0x466   :  { %v366_v18 = vor.u32 1.1754944e-38, %v365_v14  ;;  %vm364_vm13 = vcmp.eq.f32.partialorder %v363_v16, 8.507059e+37 }
 0x46a   :  { %v965_v10 = vpop.eup %964 }
 0x46b   :  { %v355_v12 = vmul.f32 %v965_v10, %v350_v9  ;;  %vm360_vm10 = vweird.f32 %v965_v10 }
 0x46c   :  { %vm361_vm12 = vmor %vm359_vm11, %vm360_vm10 }
 0x46d   :  { %v356_v13 = vsub.f32 1.0, %v355_v12 }
 0x46f   :  { %v357_v15 = vmul.f32 %v965_v10, %v356_v13 }
 0x471   :  { %v358_v17 = vadd.f32 %v965_v10, %v357_v15  ;;  %v1259_v15 = vpop.f32.mrf.mxu0 }
 0x473   :  { %v362_v19 = vsel %vm361_vm12, %v965_v10, %v358_v17 }
 0x474   :  { %v367_v21 = vsel %vm364_vm13, %v366_v18, %v362_v19 }
 0x475   :  { %v382_v22 = vmul.f32 %v961_v54, %v367_v21 }
 0x476   :  { %v496_v23 = vpop.permute.xlu0 %495 }
 0x477   :  { %914 = vmatmul.msk.f32.vlgmr.msrb.gmra.mxu3 %vm119_vm1, %v382_v22 }
 0x47f   :  { %921 = vmatmul.msk.f32.vlgmr.msra.gmra.mxu3 %vm119_vm1, %v496_v23 }
 0x4b4   :  { %v272_v24 = vpop.f32.mrf.mxu3 }
 0x4b5   :  { %919 = vmatmul.msk.f32.gmra.mxu0 %vm119_vm1, %v272_v24 }
 0x4b7   :  { %v329_v25 = vpop.f32.mrf.mxu2 }
 0x4b8   :  { %v333_v26 = vmul.f32 0.35355338, %v329_v25 }
 0x4ba   :  { %v335_v27 = vadd.f32 %v333_v26, %v1193_v11 }
 0x4bc   :  { %v339_v28 = vsel %vm119_vm1, %v335_v27, -inf }
 0x4bd   :  { %340 = vmax.xlane.f32.xlu2 %v339_v28 }
 0x4d5   :  { %523 = vrot.lane.b32.xlu2 %v1198_v20, %s1126_s13 }
 0x4fa   :  { %v407_v30 = vpop.f32.mrf.mxu3 }
 0x4fb   :  { %916 = vmatmul.msk.f32.vlgmr.msra.gmra.mxu2 %vm119_vm1, %v407_v30 }
 0x502   :  { %v520_v31 = vpop.f32.mrf.mxu3 }
 0x503   :  { %v551_v32 = vmul.f32 0.35355338, %v520_v31 }
 0x505   :  { %v553_v33 = vadd.f32 %v551_v32, %v1193_v11 }
 0x507   :  { %v555_v34 = vsel %vm119_vm1, %v553_v33, -inf }
 0x508   :  { %556 = vmax.xlane.f32.xlu1 %v555_v34 }
 0x521   :  { %410 = vrot.lane.b32.xlu1 %v1198_v20, %s1125_s12 }
 0x529   :  { %689 = vrot.lane.b32.xlu1 %v1179_v5, %s1127_s14 }
 0x530   :  { %v341_v35 = vpop.xlane.xlu2 %340 }
 0x531   :  { %v343_v36 = vsub.f32 %v335_v27, %v341_v35  ;;  %715 = vrot.lane.b32.xlu1 %v1198_v20, %s1128_s15  ;;  %v655_v27 = vld [vmem:[#allocation7 + $0x10] sm:$0xff] }
 0x532   :  { %v1262_v17 = vpop.f32.mrf.mxu0  ;;  %677 = vmatpush.msrb.mxu2 %v655_v27 }
 0x533   :  { %v346_v37 = vmul.f32 1.442695, %v343_v36 }
 0x535   :  { %966 = vpow2.f32 %v346_v37 }
 0x538   :  { %v524_v60 = vpop.permute.xlu2 %523 }
 0x53b   :  { %v967_v38 = vpop.eup %966 }
 0x53c   :  { %v351_v39 = vsel %vm119_vm1, %v967_v38, 0.0 }
 0x53d   :  { %352 = vadd.xlane.f32.xlu0 %v351_v39 }
 0x551   :  { %525 = vrot.lane.b32.xlu0 %v1198_v20, %s1124_s11 }
 0x559   :  { %603 = vrot.lane.b32.xlu0 %v1179_v5, %s1129_s16 }
 0x561   :  { %687 = vrot.lane.b32.xlu0 %v1179_v5, %s1128_s15 }
 0x57b   :  { %v557_v40 = vpop.xlane.xlu1 %556 }
 0x57c   :  { %v561_v41 = vsub.f32 %v553_v33, %v557_v40 }
 0x57e   :  { %v563_v42 = vmul.f32 1.442695, %v561_v41 }
 0x580   :  { %968 = vpow2.f32 %v563_v42 }
 0x586   :  { %v969_v43 = vpop.eup %968 }
 0x587   :  { %v567_v44 = vsel %vm119_vm1, %v969_v43, 0.0 }
 0x588   :  { %568 = vadd.xlane.f32.xlu2 %v567_v44 }
 0x593   :  { %v411_v45 = vpop.permute.xlu1 %410 }
 0x594   :  { %431 = vmatpush.msrb.mxu1 %v411_v45 }
 0x59b   :  { %v690_v46 = vpop.permute.xlu1 %689 }
 0x59c   :  { %928 = vmatpush.xpose.msk.msra.mxu0 %vm119_vm1, %v690_v46 }
 0x5a0   :  { %717 = vrot.lane.b32.xlu2 %v1198_v20, %s1127_s14 }
 0x5a3   :  { %v716_v14 = vpop.permute.xlu1 %715 }
 0x5b0   :  { %v353_v47 = vpop.xlane.xlu0 %352 }
 0x5b1   :  { %970 = vrcp.f32 %v353_v47  ;;  %v379_v51 = vand.u32 2147483648, %v353_v47  ;;  %v377_v53 = vand.u32 2147483647, %v353_v47  ;;  %vm373_vm15 = vweird.f32 %v353_v47 }
 0x5b3   :  { %v380_v55 = vor.u32 1.1754944e-38, %v379_v51  ;;  %vm378_vm3 = vcmp.eq.f32.partialorder %v377_v53, 8.507059e+37 }
 0x5b7   :  { %v971_v48 = vpop.eup %970 }
 0x5b8   :  { %v369_v49 = vmul.f32 %v971_v48, %v353_v47  ;;  %vm374_vm14 = vweird.f32 %v971_v48 }
 0x5b9   :  { %vm375_vm2 = vmor %vm373_vm15, %vm374_vm14 }
 0x5ba   :  { %v370_v50 = vsub.f32 1.0, %v369_v49 }
 0x5bc   :  { %v371_v52 = vmul.f32 %v971_v48, %v370_v50 }
 0x5be   :  { %v372_v54 = vadd.f32 %v971_v48, %v371_v52 }
 0x5c0   :  { %v376_v56 = vsel %vm375_vm2, %v971_v48, %v372_v54 }
 0x5c1   :  { %v381_v57 = vsel %vm378_vm3, %v380_v55, %v376_v56 }
 0x5c2   :  { %v383_v58 = vmul.f32 %v967_v38, %v381_v57 }
 0x5c3   :  { %v526_v59 = vpop.permute.xlu0 %525 }
 0x5c4   :  { %915 = vmatmul.msk.f32.vlgmr.msrb.gmra.mxu1 %vm119_vm1, %v383_v58 }
 0x5c5   :  { %922 = vmatpush.xpose.msk.msra.mxu1 %vm119_vm1, %v526_v59 }
 0x5cb   :  { %v604_v61 = vpop.permute.xlu0 %603 }
 0x5cc   :  { %923 = vmatmul.msk.f32.vlgmr.msra.gmra.mxu1 %vm119_vm1, %v524_v60  ;;  %624 = vmatpush.msrb.mxu3 %v604_v61 }
 0x5d3   :  { %v688_v62 = vpop.permute.xlu0 %687 }
 0x5d4   :  { %929 = vmatmul.msk.f32.vlgmr.msra.gmra.mxu0 %vm119_vm1, %v688_v62 }
 0x5fb   :  { %v569_v63 = vpop.xlane.xlu2 %568 }
 0x5fc   :  { %972 = vrcp.f32 %v569_v63  ;;  %v584_v4 = vand.u32 2147483648, %v569_v63  ;;  %v582_v7 = vand.u32 2147483647, %v569_v63  ;;  %vm578_vm5 = vweird.f32 %v569_v63 }
 0x5fe   :  { %v585_v9 = vor.u32 1.1754944e-38, %v584_v4  ;;  %vm583_vm7 = vcmp.eq.f32.partialorder %v582_v7, 8.507059e+37 }
 0x602   :  { %v973_v0 = vpop.eup %972 }
 0x603   :  { %v574_v1 = vmul.f32 %v973_v0, %v569_v63  ;;  %v718_v2 = vpop.permute.xlu2 %717  ;;  %vm579_vm4 = vweird.f32 %v973_v0 }
 0x604   :  { %930 = vmatpush.xpose.msk.msra.mxu3 %vm119_vm1, %v718_v2  ;;  %vm580_vm6 = vmor %vm578_vm5, %vm579_vm4 }
 0x605   :  { %v575_v3 = vsub.f32 1.0, %v574_v1 }
 0x607   :  { %v576_v6 = vmul.f32 %v973_v0, %v575_v3 }
 0x609   :  { %v577_v8 = vadd.f32 %v973_v0, %v576_v6 }
 0x60b   :  { %v581_v10 = vsel %vm580_vm6, %v973_v0, %v577_v8 }
 0x60c   :  { %v586_v12 = vsel %vm583_vm7, %v585_v9, %v581_v10 }
 0x60d   :  { %v601_v13 = vmul.f32 %v969_v43, %v586_v12 }
 0x60f   :  { %924 = vmatmul.msk.f32.vlgmr.msrb.gmra.mxu3 %vm119_vm1, %v601_v13 }
 0x617   :  { %931 = vmatmul.msk.f32.vlgmr.msra.gmra.mxu3 %vm119_vm1, %v716_v14 }
 0x641   :  { %v433_v16 = vpop.f32.mrf.mxu1 }
 0x642   :  { %917 = vmatmul.msk.f32.gmra.mxu2 %vm119_vm1, %v433_v16 }
 0x649   :  { %v548_v18 = vpop.f32.mrf.mxu1 }
 0x64a   :  { %v552_v19 = vmul.f32 0.35355338, %v548_v18 }
 0x64c   :  { %v554_v21 = vadd.f32 %v552_v19, %v1193_v11 }
 0x64e   :  { %v558_v22 = vsel %vm119_vm1, %v554_v21, -inf }
 0x64f   :  { %559 = vmax.xlane.f32.xlu2 %v558_v22 }
 0x651   :  { %v712_v23 = vpop.f32.mrf.mxu0 }
 0x652   :  { %v743_v24 = vmul.f32 0.35355338, %v712_v23 }
 0x654   :  { %v745_v25 = vadd.f32 %v743_v24, %v1193_v11 }
 0x656   :  { %v747_v26 = vsel %vm119_vm1, %v745_v25, -inf }
 0x657   :  { %748 = vmax.xlane.f32.xlu0 %v747_v26 }
 0x692   :  { %v626_v28 = vpop.f32.mrf.mxu3 }
 0x693   :  { %926 = vmatmul.msk.f32.vlgmr.msrb.gmra.mxu2 %vm119_vm1, %v626_v28 }
 0x69a   :  { %v740_v29 = vpop.f32.mrf.mxu3 }
 0x69b   :  { %v744_v30 = vmul.f32 0.35355338, %v740_v29  ;;  %v460_v29 = vpop.f32.mrf.mxu2 }
 0x69d   :  { %v746_v31 = vadd.f32 %v744_v30, %v1193_v11 }
 0x69f   :  { %v750_v32 = vsel %vm119_vm1, %v746_v31, -inf }
 0x6a0   :  { %751 = vmax.xlane.f32.xlu1 %v750_v32  ;;  %v490_v32 = vadd.f32 %v1259_v15, %v460_v29 }
 0x6c2   :  { %v560_v33 = vpop.xlane.xlu2 %559 }
 0x6c3   :  { %v562_v34 = vsub.f32 %v554_v21, %v560_v33 }
 0x6c5   :  { %v565_v35 = vmul.f32 1.442695, %v562_v34  ;;  %v463_v30 = vpop.f32.mrf.mxu2 }
 0x6c7   :  { %974 = vpow2.f32 %v565_v35 }
 0x6ca   :  { %v749_v36 = vpop.xlane.xlu0 %748 }
 0x6cb   :  { %v753_v37 = vsub.f32 %v745_v25, %v749_v36  ;;  %v847_v25 = vld [vmem:[#allocation7 + $0x18] sm:$0xff] }
 0x6cc   :  { %869 = vmatpush.msrb.mxu3 %v847_v25 }
 0x6cd   :  { %v975_v38 = vpop.eup %974  ;;  %v755_v39 = vmul.f32 1.442695, %v753_v37  ;;  %v493_v37 = vadd.f32 %v1262_v17, %v463_v30 }
 0x6ce   :  { %v570_v40 = vsel %vm119_vm1, %v975_v38, 0.0 }
 0x6cf   :  { %976 = vpow2.f32 %v755_v39  ;;  %571 = vadd.xlane.f32.xlu2 %v570_v40 }
 0x6d5   :  { %v977_v41 = vpop.eup %976 }
 0x6d6   :  { %v759_v42 = vsel %vm119_vm1, %v977_v41, 0.0 }
 0x6d7   :  { %760 = vadd.xlane.f32.xlu0 %v759_v42 }
 0x6e7   :  { %629 = vrot.lane.b32.xlu2 %v1198_v20, %s1129_s16 }
 0x6eb   :  { %795 = vrot.lane.b32.xlu0 %v1179_v5, %s1130_s17 }
 0x713   :  { %v752_v11 = vpop.xlane.xlu1 %751 }
 0x714   :  { %v754_v43 = vsub.f32 %v746_v31, %v752_v11 }
 0x716   :  { %v757_v44 = vmul.f32 1.442695, %v754_v43  ;;  %v679_v31 = vpop.f32.mrf.mxu2 }
 0x717   :  { %v685_v33 = vadd.f32 %v679_v31, %v490_v32 }
 0x718   :  { %978 = vpow2.f32 %v757_v44 }
 0x71e   :  { %v979_v45 = vpop.eup %978 }
 0x71f   :  { %v762_v46 = vsel %vm119_vm1, %v979_v45, 0.0 }
 0x720   :  { %763 = vadd.xlane.f32.xlu1 %v762_v46 }
 0x739   :  { %821 = vrot.lane.b32.xlu1 %v1198_v20, %s1130_s17 }
 0x742   :  { %v572_v47 = vpop.xlane.xlu2 %571 }
 0x743   :  { %980 = vrcp.f32 %v572_v47  ;;  %v598_v5 = vand.u32 2147483648, %v572_v47  ;;  %v596_v54 = vand.u32 2147483647, %v572_v47  ;;  %vm592_vm9 = vweird.f32 %v572_v47 }
 0x745   :  { %v599_v57 = vor.u32 1.1754944e-38, %v598_v5  ;;  %vm597_vm11 = vcmp.eq.f32.partialorder %v596_v54, 8.507059e+37 }
 0x749   :  { %v981_v48 = vpop.eup %980 }
 0x74a   :  { %v588_v49 = vmul.f32 %v981_v48, %v572_v47  ;;  %v630_v50 = vpop.permute.xlu2 %629  ;;  %v761_v51 = vpop.xlane.xlu0 %760  ;;  %vm593_vm8 = vweird.f32 %v981_v48 }
 0x74b   :  { %982 = vrcp.f32 %v761_v51  ;;  %650 = vmatpush.msrb.mxu1 %v630_v50  ;;  %vm594_vm10 = vmor %vm592_vm9, %vm593_vm8  ;;  %v776_v62 = vand.u32 2147483648, %v761_v51  ;;  %v774_v0 = vand.u32 2147483647, %v761_v51  ;;  %vm770_vm13 = vweird.f32 %v761_v51 }
 0x74c   :  { %v589_v52 = vsub.f32 1.0, %v588_v49 }
 0x74d   :  { %v777_v2 = vor.u32 1.1754944e-38, %v776_v62  ;;  %vm775_vm15 = vcmp.eq.f32.partialorder %v774_v0, 8.507059e+37 }
 0x74e   :  { %v590_v53 = vmul.f32 %v981_v48, %v589_v52 }
 0x750   :  { %v591_v55 = vadd.f32 %v981_v48, %v590_v53 }
 0x751   :  { %v983_v56 = vpop.eup %982 }
 0x752   :  { %v595_v58 = vsel %vm594_vm10, %v981_v48, %v591_v55  ;;  %v766_v20 = vmul.f32 %v983_v56, %v761_v51  ;;  %vm771_vm12 = vweird.f32 %v983_v56 }
 0x753   :  { %v600_v59 = vsel %vm597_vm11, %v599_v57, %v595_v58  ;;  %vm772_vm14 = vmor %vm770_vm13, %vm771_vm12 }
 0x754   :  { %v767_v60 = vsub.f32 1.0, %v766_v20  ;;  %v602_v61 = vmul.f32 %v975_v38, %v600_v59 }
 0x756   :  { %v768_v63 = vmul.f32 %v983_v56, %v767_v60  ;;  %925 = vmatmul.msk.f32.vlgmr.msrb.gmra.mxu1 %vm119_vm1, %v602_v61 }
 0x758   :  { %v769_v1 = vadd.f32 %v983_v56, %v768_v63 }
 0x75a   :  { %v773_v3 = vsel %vm772_vm14, %v983_v56, %v769_v1 }
 0x75b   :  { %v778_v4 = vsel %vm775_vm15, %v777_v2, %v773_v3 }
 0x75c   :  { %v793_v6 = vmul.f32 %v977_v41, %v778_v4 }
 0x75d   :  { %v796_v7 = vpop.permute.xlu0 %795 }
 0x75e   :  { %816 = vmatpush.msra.mxu1 %v796_v7 }
 0x75f   :  { %932 = vmatmul.msk.f32.vlgmr.msra.gmra.mxu1 %vm119_vm1, %v793_v6 }
 0x793   :  { %v764_v8 = vpop.xlane.xlu1 %763 }
 0x794   :  { %984 = vrcp.f32 %v764_v8  ;;  %v790_v16 = vand.u32 2147483648, %v764_v8  ;;  %vm784_vm3 = vweird.f32 %v764_v8  ;;  %v788_v18 = vand.u32 2147483647, %v764_v8 }
 0x796   :  { %v791_v21 = vor.u32 1.1754944e-38, %v790_v16  ;;  %vm789_vm5 = vcmp.eq.f32.partialorder %v788_v18, 8.507059e+37 }
 0x79a   :  { %v985_v9 = vpop.eup %984 }
 0x79b   :  { %v780_v10 = vmul.f32 %v985_v9, %v764_v8  ;;  %vm785_vm2 = vweird.f32 %v985_v9 }
 0x79c   :  { %vm786_vm4 = vmor %vm784_vm3, %vm785_vm2 }
 0x79d   :  { %v781_v12 = vsub.f32 1.0, %v780_v10 }
 0x79f   :  { %v782_v13 = vmul.f32 %v985_v9, %v781_v12 }
 0x7a1   :  { %v783_v14 = vadd.f32 %v985_v9, %v782_v13 }
 0x7a3   :  { %v787_v19 = vsel %vm786_vm4, %v985_v9, %v783_v14 }
 0x7a4   :  { %v792_v22 = vsel %vm789_vm5, %v791_v21, %v787_v19 }
 0x7a5   :  { %v794_v24 = vmul.f32 %v979_v45, %v792_v22 }
 0x7ab   :  { %v822_v23 = vpop.permute.xlu1 %821 }
 0x7ac   :  { %842 = vmatpush.msrb.mxu0 %v822_v23 }
 0x7ad   :  { %933 = vmatmul.msk.f32.vlgmr.msrb.gmra.mxu0 %vm119_vm1, %v794_v24 }
 0x7d3   :  { %v652_v26 = vpop.f32.mrf.mxu1 }
 0x7d4   :  { %927 = vmatmul.msk.f32.gmra.mxu2 %vm119_vm1, %v652_v26 }
 0x7dc   :  { %v818_v27 = vpop.f32.mrf.mxu1 }
 0x7dd   :  { %934 = vmatmul.msk.f32.vlgmr.msrb.gmra.mxu3 %vm119_vm1, %v818_v27 }
 0x82a   :  { %v844_v28 = vpop.f32.mrf.mxu0 }
 0x82b   :  { %935 = vmatmul.msk.f32.gmra.mxu3 %vm119_vm1, %v844_v28 }
 0x857   :  { %v682_v36 = vpop.f32.mrf.mxu2 }
 0x858   :  { %v686_v38 = vadd.f32 %v682_v36, %v493_v37 }
 0x860   :  { %v871_v34 = vpop.f32.mrf.mxu3 }
 0x861   :  { %v877_v35 = vadd.f32 %v871_v34, %v685_v33 }
 0x863   :  { %879 = vst.msk [vmem:[#allocation10] sm:$0xff] %vm85_vm0, %v877_v35 }
 0x8ae   :  { %v874_v39 = vpop.f32.mrf.mxu3 }
 0x8af   :  { %v878_v40 = vadd.f32 %v874_v39, %v686_v38 }
 0x8b1   :  { %880 = vst.msk [vmem:[#allocation10 + $0x8] sm:$0xff] %vm85_vm0, %v878_v40 }
 0x8b2   :  { %893 = dma.vmem_to_hbm [thread:$0]  %s886_s19, 256, %s888_s22, [#allocation4], %s1115_s23, %s1115_s23, %s1116_s24  }
 0x8b3   :  { %1112 = dma.done.wait [#allocation4], 256  }
 0x8b4   :  { %1113 = vsyncadd [#allocation4], 4294967040 }
 0x8b5   :  { %898 = vsyncpa [#allocation3], 1 }
 0x8b6   :  { %899 = vsyncpa [#allocation6], 1 }
 0x8b7   :  { %900 = vsyncpa [#allocation9], 1 }
 0x8b8   :  { %901 = vsyncpa [#allocation4], 1 }

</bundles_post_ra>
